<compile_context>
chip_gen: v7x
topology: tpu7x:2x2x1
jax: 0.10.0
libtpu: 0.0.40
codegen_flags: <defaults>
</compile_context>

<pallas_src>
import jax
import jax.numpy as jnp
from jax import lax
from jax.experimental import pallas as pl
from jax.experimental.pallas import tpu as pltpu


# ---------------------------------------------------------------------------
# helpers
# ---------------------------------------------------------------------------

def _tile(dim, target, align):
    """Largest multiple of `align` that divides `dim` and is <= `target`.

    Falls back to the full dimension, which is always a legal block size."""
    if dim <= target:
        return dim
    t = (target // align) * align
    while t >= align:
        if dim % t == 0:
            return t
        t -= align
    return dim


def _compiler_params(semantics, block_bytes, scratch_bytes=0):
    """CompilerParams with a VMEM limit derived from the actual tile sizes."""
    est = 2 * block_bytes + scratch_bytes          # double-buffered pipeline
    limit = int(min(max(2 * est + (16 << 20), 32 << 20), 48 << 20))
    return pltpu.CompilerParams(dimension_semantics=semantics,
                                vmem_limit_bytes=limit)


# ---------------------------------------------------------------------------
# tiled linear (projection) kernels
# ---------------------------------------------------------------------------

def _linear_kernel(x_ref, w_ref, o_ref):
    o_ref[...] = jnp.dot(x_ref[...], w_ref[...],
                         preferred_element_type=jnp.float32).astype(o_ref.dtype)


def _linear_bias_kernel(x_ref, w_ref, b_ref, o_ref):
    acc = jnp.dot(x_ref[...], w_ref[...], preferred_element_type=jnp.float32)
    o_ref[...] = (acc + b_ref[...]).astype(o_ref.dtype)


def _linear(x2d, w, bias=None, *, row_tile=256, col_tile=512):
    """out = x2d @ w (+ bias), tiled over rows and output columns."""
    R, K = x2d.shape
    Kw, C = w.shape
    assert K == Kw
    tr = _tile(R, row_tile, 8)      # sublane dim of the x / out blocks
    tc = _tile(C, col_tile, 128)    # lane dim of the w / out blocks (lane-dense)
    # TODO(synk): add a K grid axis + f32 accumulator scratch if the contraction
    # dim ever grows beyond a few thousand; CrossAttention dims fit one block.
    itemsize = jnp.dtype(x2d.dtype).itemsize
    block_bytes = (tr * K + K * tc + tr * tc) * itemsize

    in_specs = [pl.BlockSpec((tr, K), lambda r, c: (r, 0)),
                pl.BlockSpec((K, tc), lambda r, c: (0, c))]
    if bias is None:
        kernel, args = _linear_kernel, (x2d, w)
    else:
        in_specs.append(pl.BlockSpec((1, tc), lambda r, c: (0, c)))
        kernel, args = _linear_bias_kernel, (x2d, w, bias.reshape(1, C))
        block_bytes += tc * itemsize

    return pl.pallas_call(
        kernel,
        out_shape=jax.ShapeDtypeStruct((R, C), x2d.dtype),
        grid_spec=pltpu.PrefetchScalarGridSpec(
            num_scalar_prefetch=0,
            grid=(R // tr, C // tc),
            in_specs=in_specs,
            out_specs=pl.BlockSpec((tr, tc), lambda r, c: (r, c)),
        ),
        compiler_params=_compiler_params(("parallel", "parallel"), block_bytes),
    )(*args)


# ---------------------------------------------------------------------------
# flash-style attention kernel
# ---------------------------------------------------------------------------

def _flash_kernel(q_ref, k_ref, v_ref, o_ref, m_sc, l_sc, acc_sc):
    kv = pl.program_id(2)

    @pl.when(kv == 0)
    def _():
        m_sc[...] = jnp.full_like(m_sc[...], -jnp.inf)
        l_sc[...] = jnp.zeros_like(l_sc[...])
        acc_sc[...] = jnp.zeros_like(acc_sc[...])

    q = q_ref[0]                    # (TQ, d); softmax scale already folded in
    k = k_ref[0]                    # (TM, d)
    v = v_ref[0]                    # (TM, d)

    # q @ k^T without materialising a transpose: contract the last dims.
    s = lax.dot_general(q, k, dimension_numbers=(((1,), (1,)), ((), ())),
                        preferred_element_type=jnp.float32)     # (TQ, TM)

    m_prev = m_sc[...]
    m_new = jnp.maximum(m_prev, jnp.max(s, axis=-1, keepdims=True))
    alpha = jnp.exp(m_prev - m_new)
    p = jnp.exp(s - m_new)
    l_sc[...] = alpha * l_sc[...] + jnp.sum(p, axis=-1, keepdims=True)
    acc_sc[...] = alpha * acc_sc[...] + jnp.dot(
        p.astype(v.dtype), v, preferred_element_type=jnp.float32)
    m_sc[...] = m_new

    @pl.when(kv == pl.num_programs(2) - 1)
    def _():
        # Deferred normalisation: scale the (TQ, d) accumulator once instead of
        # the (TQ, TM) probability matrix.  Approximate (EUP-slot) reciprocal
        # for reduced-precision outputs; exact for f32 so the test stays tight.
        approx = jnp.dtype(o_ref.dtype) != jnp.dtype(jnp.float32)
        inv_l = pl.reciprocal(l_sc[...], approx=approx)
        o_ref[0] = (acc_sc[...] * inv_l).astype(o_ref.dtype)


def _flash_attention(q, k, v, *, q_tile=256, kv_tile=256):
    """Per-(batch*head) attention with online softmax.  q is pre-scaled."""
    BH, N, d = q.shape
    _, M, _ = k.shape
    tq = _tile(N, q_tile, 8)
    tm = _tile(M, kv_tile, 8)
    itemsize = jnp.dtype(q.dtype).itemsize
    block_bytes = (2 * tq * d + 2 * tm * d) * itemsize          # q, o, k, v
    scratch_bytes = tq * (d + 2) * 4

    return pl.pallas_call(
        _flash_kernel,
        out_shape=jax.ShapeDtypeStruct((BH, N, d), q.dtype),
        grid_spec=pltpu.PrefetchScalarGridSpec(
            num_scalar_prefetch=0,
            grid=(BH, N // tq, M // tm),
            in_specs=[
                pl.BlockSpec((1, tq, d), lambda b, qi, ki: (b, qi, 0)),
                pl.BlockSpec((1, tm, d), lambda b, qi, ki: (b, ki, 0)),
                pl.BlockSpec((1, tm, d), lambda b, qi, ki: (b, ki, 0)),
            ],
            out_specs=pl.BlockSpec((1, tq, d), lambda b, qi, ki: (b, qi, 0)),
            scratch_shapes=[
                pltpu.VMEM((tq, 1), jnp.float32),   # running row max
                pltpu.VMEM((tq, 1), jnp.float32),   # running denominator
                pltpu.VMEM((tq, d), jnp.float32),   # running numerator
            ],
        ),
        compiler_params=_compiler_params(
            ("parallel", "parallel", "arbitrary"), block_bytes, scratch_bytes),
    )(q, k, v)


# ---------------------------------------------------------------------------
# full CrossAttention forward pass
# ---------------------------------------------------------------------------

def cross_attention(x, context, wq, wk, wv, wo, bo, *, heads, dim_head,
                    q_tile=256, kv_tile=256):
    B, N, Dq = x.shape
    Bc, M, Dc = context.shape
    assert Bc == B
    inner = heads * dim_head
    scale = dim_head ** (-0.5)

    # Fold the softmax scale into the q projection weights (free, host side).
    wq_scaled = (wq * scale).astype(wq.dtype)
    # Fuse K and V projections into one matmul with a 2*inner-wide output.
    wkv = jnp.concatenate([wk, wv], axis=1)                    # (Dc, 2*inner)

    q2d = _linear(x.reshape(B * N, Dq), wq_scaled)             # (B*N, inner)
    kv2d = _linear(context.reshape(B * M, Dc), wkv)            # (B*M, 2*inner)
    k2d, v2d = kv2d[:, :inner], kv2d[:, inner:]

    # 'b n (h d) -> (b h) n d'  — layout plumbing only, outside the kernels.
    def split_heads(t2d, rows):
        return (t2d.reshape(B, rows, heads, dim_head)
                .transpose(0, 2, 1, 3)
                .reshape(B * heads, rows, dim_head))

    qh = split_heads(q2d, N)
    kh = split_heads(k2d, M)
    vh = split_heads(v2d, M)

    oh = _flash_attention(qh, kh, vh, q_tile=q_tile, kv_tile=kv_tile)

    # '(b h) n d -> b n (h d)'
    merged = (oh.reshape(B, heads, N, dim_head)
              .transpose(0, 2, 1, 3)
              .reshape(B * N, inner))

    o2d = _linear(merged, wo, bo)                              # (B*N, Dq)
    return o2d.reshape(B, N, Dq)


def cross_attention_ref(x, context, wq, wk, wv, wo, bo, *, heads, dim_head):
    """Pure-JAX reference mirroring the PyTorch forward pass."""
    B, N, _ = x.shape
    scale = dim_head ** (-0.5)
    q = x @ wq
    k = context @ wk
    v = context @ wv

    def split(t):  # 'b n (h d) -> (b h) n d'
        b, n, _ = t.shape
        return (t.reshape(b, n, heads, dim_head).transpose(0, 2, 1, 3)
                .reshape(b * heads, n, dim_head))

    qh, kh, vh = split(q), split(k), split(v)
    sim = jnp.einsum('bid,bjd->bij', qh, kh) * scale
    attn = jax.nn.softmax(sim, axis=-1)
    out = jnp.einsum('bij,bjd->bid', attn, vh)
    out = (out.reshape(B, heads, N, dim_head).transpose(0, 2, 1, 3)
           .reshape(B, N, heads * dim_head))  # '(b h) n d -> b n (h d)'
    return out @ wo + bo


if __name__ == "__main__":
    # Small shapes consistent with the module (cross-attention, context != x).
    B, N, M = 2, 16, 24
    query_dim, context_dim = 32, 48
    heads, dim_head = 2, 64
    inner = heads * dim_head

    key = jax.random.PRNGKey(0)
    kx, kc, kq, kk, kv, ko, kb = jax.random.split(key, 7)

    x = jax.random.normal(kx, (B, N, query_dim), dtype=jnp.float32)
    context = jax.random.normal(kc, (B, M, context_dim), dtype=jnp.float32)

    # Deterministic parameters (stored transposed relative to nn.Linear.weight).
    wq = jax.random.normal(kq, (query_dim, inner), dtype=jnp.float32) * 0.05
    wk = jax.random.normal(kk, (context_dim, inner), dtype=jnp.float32) * 0.05
    wv = jax.random.normal(kv, (context_dim, inner), dtype=jnp.float32) * 0.05
    wo = jax.random.normal(ko, (inner, query_dim), dtype=jnp.float32) * 0.05
    bo = jax.random.normal(kb, (query_dim,), dtype=jnp.float32) * 0.05

    # Small tiles so the multi-block online-softmax path is exercised even at
    # these toy sizes (2 q-tiles x 3 kv-tiles per batch*head).
    out = cross_attention(x, context, wq, wk, wv, wo, bo,
                          heads=heads, dim_head=dim_head, q_tile=8, kv_tile=8)
    out = jax.block_until_ready(out)

    ref = cross_attention_ref(x, context, wq, wk, wv, wo, bo,
                              heads=heads, dim_head=dim_head)

    assert out.shape == (B, N, query_dim)
    err = jnp.max(jnp.abs(out - ref))
    assert jnp.allclose(out, ref, rtol=1e-3, atol=1e-3), f"max abs err = {err}"
    print("KERNEL_OK")
</pallas_src>

<mosaic_0001>
module attributes {stable_mosaic.version = 11 : i64} {
  func.func @_linear_kernel(%arg0: i32, %arg1: i32, %arg2: memref<32x32xf32, #tpu.memory_space<vmem>>, %arg3: memref<32x128xf32, #tpu.memory_space<vmem>>, %arg4: memref<32x128xf32, #tpu.memory_space<vmem>>) attributes {dimension_semantics = [#tpu.dimension_semantics<parallel>, #tpu.dimension_semantics<parallel>], iteration_bounds = array<i64: 1, 1>, scalar_prefetch = 0 : i64, scratch_operands = 0 : i64, tpu.core_type = #tpu.core_type<tc>, window_params = [{transform_indices = @transform_0, window_bounds = array<i64: 32, 32>}, {transform_indices = @transform_1, window_bounds = array<i64: 32, 128>}, {transform_indices = @transform_2, window_bounds = array<i64: 32, 128>}]} {
    %c0 = arith.constant 0 : index
    %c0_0 = arith.constant 0 : index
    %0 = vector.load %arg2[%c0, %c0_0] : memref<32x32xf32, #tpu.memory_space<vmem>>, vector<32x32xf32>
    %c0_1 = arith.constant 0 : index
    %c0_2 = arith.constant 0 : index
    %1 = vector.load %arg3[%c0_1, %c0_2] : memref<32x128xf32, #tpu.memory_space<vmem>>, vector<32x128xf32>
    %cst = arith.constant dense<0.000000e+00> : vector<32x128xf32>
    %2 = tpu.matmul %0, %1, %cst {dimension_numbers = #tpu.dot_dimension_numbers<[1], [0], [0], [1], [0, 0, 1, 1], [], []>} : vector<32x32xf32>, vector<32x128xf32>, vector<32x128xf32> -> vector<32x128xf32>
    %c0_3 = arith.constant 0 : index
    %c0_4 = arith.constant 0 : index
    %3 = vector.load %arg4[%c0_3, %c0_4] : memref<32x128xf32, #tpu.memory_space<vmem>>, vector<32x128xf32>
    tpu.vector_store %arg4[%c0_3, %c0_4], %2 {strides = array<i32>} : memref<32x128xf32, #tpu.memory_space<vmem>>, vector<32x128xf32>,
    return
  }
  func.func @transform_0(%arg0: i32, %arg1: i32) -> (i32, i32) {
    %c0_i32 = arith.constant 0 : i32
    %c0_i32_0 = arith.constant 0 : i32
    return %arg0, %c0_i32 : i32, i32
  }
  func.func @transform_1(%arg0: i32, %arg1: i32) -> (i32, i32) {
    %c0_i32 = arith.constant 0 : i32
    %c0_i32_0 = arith.constant 0 : i32
    return %c0_i32, %arg1 : i32, i32
  }
  func.func @transform_2(%arg0: i32, %arg1: i32) -> (i32, i32) {
    %c0_i32 = arith.constant 0 : i32
    return %arg0, %arg1 : i32, i32
  }
}

</mosaic_0001>

<bundles_post_ra>
// kernel: tpu_custom_call.1
= control target key start
LH: loop header
LB: loop body
LE: loop exit
PB: predicated region body
PF: predicated region fallthrough
CT: control target
= control target key end

     0   :  { %7 = vsyncpa [#allocation3], 0  ;;  %s352_s0 = inlined_call_operand.hbm [shape: f32[32,32], index: 0, kind: input, shape index: {}]   ;;  %s353_s1 = inlined_call_operand.hbm [shape: f32[32,128], index: 1, kind: input, shape index: {}]   ;;  %s354_s2 = inlined_call_operand.hbm [shape: f32[32,128], index: 2, kind: output, shape index: {}]  }
   0x1   :  { %8 = vsyncpa [#allocation6], 0 }
   0x2   :  { %9 = vsyncpa [#allocation4], 0  ;;  %s283_s9 = smov [#allocation2]   ;;  %s211_s13 = scalar_lea.hbm %s352_s0, 512 }
   0x3   :  { %s15_s10 = sshll.u32 %s283_s9, 4  ;;  %p212_p0 = scmp.ne.s32.totalorder %s352_s0, %s211_s13  ;;  %s16_s10 = int_to_ptr.vmem [resolvable:$true] %s15_s10 }
   0x4   :  { %p215_p1 = scmp.lt.u32.totalorder %s211_s13, %s352_s0 }
   0x6   :  { %p217_p2 = pnand %p215_p1, %p212_p0 }
   0x8   :  { %220 = shalt.err (!%p217_p2)
}
   0x9   :  { %s221_s18 = scalar_lea.vmem %s16_s10, 512  ;;  %p226_p4 = scmp.lt.s32.totalorder %s16_s10, %s16_s10 }
   0xa   :  { %p222_p3 = scmp.ne.s32.totalorder %s16_s10, %s221_s18  ;;  %p227_p5 = scmp.lt.s32.totalorder %s221_s18, %s221_s18 }
   0xc   :  { %p228_p6 = por %p227_p5, %p226_p4 }
   0xe   :  { %p229_p7 = pnand %p228_p6, %p222_p3 }
  0x10   :  { %232 = shalt.err (!%p229_p7)
}
  0x11   :  { %s284_s19 = smov 128   ;;  %s285_s20 = smov 8  }
  0x12   :  { %21 = dma.hbm_to_vmem [thread:$0]  %s352_s0, 512, %s16_s10, [#allocation3], %s284_s19, %s284_s19, %s285_s20  }
  0x13   :  { %s286_s23 = smov [#allocation5]   ;;  %s233_s27 = scalar_lea.hbm %s353_s1, 512 }
  0x14   :  { %s27_s24 = sshll.u32 %s286_s23, 4  ;;  %p234_p8 = scmp.ne.s32.totalorder %s353_s1, %s233_s27  ;;  %s28_s24 = int_to_ptr.vmem [resolvable:$true] %s27_s24 }
  0x15   :  { %p237_p9 = scmp.lt.u32.totalorder %s233_s27, %s353_s1 }
  0x17   :  { %p239_p10 = pnand %p237_p9, %p234_p8 }
  0x19   :  { %242 = shalt.err (!%p239_p10)
}
  0x1a   :  { %s243_s4 = scalar_lea.vmem %s28_s24, 512  ;;  %p248_p12 = scmp.lt.s32.totalorder %s28_s24, %s28_s24 }
  0x1b   :  { %p244_p11 = scmp.ne.s32.totalorder %s28_s24, %s243_s4  ;;  %p249_p13 = scmp.lt.s32.totalorder %s243_s4, %s243_s4 }
  0x1d   :  { %p250_p0 = por %p249_p13, %p248_p12 }
  0x1f   :  { %p251_p1 = pnand %p250_p0, %p244_p11 }
  0x21   :  { %254 = shalt.err (!%p251_p1)
}
  0x22   :  { %33 = dma.hbm_to_vmem [thread:$0]  %s353_s1, 512, %s28_s24, [#allocation6], %s284_s19, %s284_s19, %s285_s20  }
  0x23   :  { %277 = dma.done.wait [#allocation3], 512  }
  0x24   :  { %278 = vsyncadd [#allocation3], 4294966784 }
  0x25   :  { %279 = dma.done.wait [#allocation6], 512  }
  0x26   :  { %280 = vsyncadd [#allocation6], 4294966784  ;;  %vm48_vm0 = vcmask 261120   ;;  %v44_v0 = vld [vmem:[#allocation5] sm:$0xff]  ;;  %v45_v1 = vld [vmem:[#allocation5 + $0x8] sm:$0xff]  ;;  %s287_s1 = smov [#allocation7]  }
  0x27   :  { %v46_v2 = vld [vmem:[#allocation5 + $0x10] sm:$0xff]  ;;  %v194_v3 = vpack.c.bf16 %v45_v1, %v44_v0  ;;  %v47_v4 = vld [vmem:[#allocation5 + $0x18] sm:$0xff]  ;;  %v40_v5 = vld [vmem:[#allocation2] sm:$0xff]  ;;  %s155_s6 = sshll.u32 %s287_s1, 4  ;;  %s156_s6 = int_to_ptr.vmem [resolvable:$true] %s155_s6 }
  0x28   :  { %v42_v6 = vld [vmem:[#allocation2 + $0x10] sm:$0xff]  ;;  %v198_v7 = vpack.c.bf16 %v47_v4, %v46_v2  ;;  %188 = vmatprep.mubr.msk.f32.mxu0 %vm48_vm0, %v40_v5  ;;  %v41_v8 = vld [vmem:[#allocation2 + $0x8] sm:$0xff]  ;;  %v43_v9 = vld [vmem:[#allocation2 + $0x18] sm:$0xff]  ;;  %s255_s7 = scalar_lea.vmem %s156_s6, 512  ;;  %p260_p3 = scmp.lt.s32.totalorder %s156_s6, %s156_s6 }
  0x29   :  { %191 = vmatprep.mubr.msk.f32.mxu1 %vm48_vm0, %v42_v6  ;;  %195 = vmatprep.subr.bf16.mxu0 %v194_v3  ;;  %p256_p2 = scmp.ne.s32.totalorder %s156_s6, %s255_s7  ;;  %p261_p4 = scmp.lt.s32.totalorder %s255_s7, %s255_s7 }
  0x2a   :  { %202 = vmatprep.subr.bf16.mxu1 %v194_v3  ;;  %197 = vmatpush3.bf16.msra.mxu0 %v194_v3 }
  0x2b   :  { %204 = vmatpush3.bf16.msra.mxu1 %v194_v3  ;;  %199 = vmatprep.subr.bf16.mxu0 %v198_v7  ;;  %p262_p5 = por %p261_p4, %p260_p3 }
  0x2c   :  { %203 = vmatprep.subr.bf16.mxu1 %v198_v7 }
  0x2d   :  { %p263_p6 = pnand %p262_p5, %p256_p2 }
  0x2e   :  { %201 = vmatpush3.bf16.msra.mxu0 %v198_v7 }
  0x2f   :  { %205 = vmatpush3.bf16.msra.mxu1 %v198_v7 }
  0x31   :  { %189 = vmatmul.mubr.msk.f32.vlgmr.msra.gmra.mrb[0].mxu0 %vm48_vm0, %v41_v8 }
  0x32   :  { %192 = vmatmul.mubr.msk.f32.vlgmr.msra.gmra.mrb[0].mxu1 %vm48_vm0, %v43_v9 }
 0x104   :  { %v190_v10 = vpop.f32.mrb[0].mxu0 }
 0x105   :  { %v193_v11 = vpop.f32.mrb[0].mxu1  ;;  %147 = vst [vmem:[#allocation7 + $0x8] sm:$0xff] %v190_v10  ;;  %v127_v12 = vpop.f32.mrb[1].mxu0 }
 0x106   :  { %149 = vst [vmem:[#allocation7 + $0x18] sm:$0xff] %v193_v11  ;;  %v137_v13 = vpop.f32.mrb[1].mxu1  ;;  %146 = vst [vmem:[#allocation7] sm:$0xff] %v127_v12 }
 0x107   :  { %148 = vst [vmem:[#allocation7 + $0x10] sm:$0xff] %v137_v13 }
 0x108   :  { %266 = shalt.err (!%p263_p6)
}
 0x109   :  { %s267_s10 = scalar_lea.hbm %s354_s2, 512 }
 0x10a   :  { %p268_p7 = scmp.ne.s32.totalorder %s354_s2, %s267_s10  ;;  %p271_p8 = scmp.lt.u32.totalorder %s267_s10, %s354_s2 }
 0x10c   :  { %p273_p9 = pnand %p271_p8, %p268_p7 }
 0x10e   :  { %276 = shalt.err (!%p273_p9)
}
 0x10f   :  { %161 = dma.vmem_to_hbm [thread:$0]  %s156_s6, 512, %s354_s2, [#allocation4], %s284_s19, %s284_s19, %s285_s20  }
 0x110   :  { %281 = dma.done.wait [#allocation4], 512  }
 0x111   :  { %282 = vsyncadd [#allocation4], 4294966784 }
 0x112   :  { %165 = vsyncpa [#allocation3], 1 }
 0x113   :  { %166 = vsyncpa [#allocation6], 1 }
 0x114   :  { %167 = vsyncpa [#allocation4], 1 }

</bundles_post_ra>
